<compile_context>
chip_gen: v7x
topology: tpu7x:2x2x1
jax: 0.10.0
libtpu: 0.0.40
codegen_flags: <defaults>
</compile_context>

<pallas_src>
import functools
import math

import jax
import jax.numpy as jnp
from jax import lax
from jax.experimental import pallas as pl
from jax.experimental.pallas import tpu as pltpu

_SQRT2 = math.sqrt(2.0)


def _gelu_exact(x):
    # Matches torch.nn.GELU() default (erf-based, not tanh approximation).
    return 0.5 * x * (1.0 + lax.erf(x / _SQRT2))


def _round_up(x, m):
    return (x + m - 1) // m * m


def _cdiv(a, b):
    return -(-a // b)


# ---------------------------------------------------------------------------
# Kernel bodies
# ---------------------------------------------------------------------------
def _out_stage1_kernel_resident(x_ref, w1_ref, b1_ref, w2_ref, b2_ref, o_ref):
    """Single K step: w1 fully resident, no accumulator scratch.

    x_ref: (TM, D)   w1_ref: (D, H)   b1_ref/w2_ref: (1, H) f32
    b2_ref: (1,) f32 in SMEM          o_ref: (TM, 1)
    """
    xb = x_ref[...].astype(w1_ref.dtype)
    h = jnp.dot(xb, w1_ref[...], preferred_element_type=jnp.float32)
    h = _gelu_exact(h + b1_ref[...])
    # Second linear (H -> 1): VPU multiply + XLU lane reduction instead of a
    # [TM,H]x[H,1] matmul that would use a single MXU output column.
    o = jnp.sum(h * w2_ref[...], axis=-1, keepdims=True) + b2_ref[0]
    o_ref[...] = o.astype(o_ref.dtype)


def _out_stage1_kernel_streamed(x_ref, w1_ref, b1_ref, w2_ref, b2_ref, o_ref,
                                acc_ref, *, tk, d_total, mask_last_k):
    """D streamed over the K grid axis with a resident f32 accumulator.

    x_ref: (TM, TK)   w1_ref: (TK, H)   acc_ref: (TM, H) f32 scratch.
    """
    k = pl.program_id(1)
    nk = pl.num_programs(1)

    @pl.when(k == 0)
    def _init():
        acc_ref[...] = jnp.zeros_like(acc_ref)

    xb = x_ref[...].astype(w1_ref.dtype)
    if mask_last_k:
        # x is NOT padded in D, so the last K block reads stale lanes past D.
        # Zero them explicitly (w1's tail rows are zero-padded in the wrapper);
        # relying on "garbage * 0 == 0" would be unsafe for NaN/Inf garbage.
        col = lax.broadcasted_iota(jnp.int32, xb.shape, dimension=1)
        valid = d_total - k * tk  # >= tk for every block except the last one
        xb = jnp.where(col < valid, xb, jnp.zeros_like(xb))

    acc_ref[...] += jnp.dot(xb, w1_ref[...], preferred_element_type=jnp.float32)

    @pl.when(k == nk - 1)
    def _finalize():
        h = _gelu_exact(acc_ref[...] + b1_ref[...])
        o = jnp.sum(h * w2_ref[...], axis=-1, keepdims=True) + b2_ref[0]
        o_ref[...] = o.astype(o_ref.dtype)


# ---------------------------------------------------------------------------
# Tiling / VMEM policy
# ---------------------------------------------------------------------------
def _vmem_budget_bytes():
    """Chip-derived scoped-VMEM budget (leaves headroom for compiler scratch)."""
    phys = 64 * 1024 * 1024
    try:
        info = pltpu.get_tpu_info()
        cap = getattr(info, "vmem_capacity_bytes", None)
        if cap:
            phys = int(cap)
    except Exception:  # pragma: no cover - conservative fallback
        pass
    # ~112 MiB on 128 MiB chips (v5e/v6e), ~56 MiB on v7x's 64 MiB.
    return min(int(phys * 0.875), 112 * 1024 * 1024)


def _choose_config(N, D, H, x_isz, w_isz, tile_m, max_tile_k, vmem_budget,
                   min_row_tiles):
    n8 = _round_up(max(N, 1), 8)
    Hp = _round_up(H, 128)
    usable = int(vmem_budget * 0.75)  # headroom on top of the scoped limit
    small_fixed = 2 * 2 * 8 * Hp * 4  # b1 + w2, (8,H)-padded, double-buffered

    def footprint(tm, tk, nk):
        tkp = _round_up(tk, 128)
        x_b = 2 * tm * tkp * x_isz            # x tile, double-buffered
        w1_b = 2 * tkp * Hp * w_isz           # w1 tile, double-buffered
        out_b = 2 * tm * 128 * 4              # (tm,1) output, lane-padded
        acc_b = tm * Hp * 4 if nk > 1 else 0  # resident accumulator scratch
        tmp_b = 2 * tm * Hp * 4               # h / GELU intermediates
        return x_b + w1_b + out_b + acc_b + tmp_b + small_fixed

    # --- reduction (D) tiling: prefer a fully resident w1 (single K step) ---
    if max_tile_k is not None and D > max_tile_k:
        tk = max(128, (min(max_tile_k, D) // 128) * 128)
    else:
        tk = D
        probe_tm = 256 if n8 >= 256 else n8
        if max_tile_k is None and footprint(probe_tm, D, 1) > usable:
            # Weight too large to keep resident -> stream D in chunks.
            tk = 2048
            while tk > 128 and 2 * _round_up(tk, 128) * Hp * w_isz > usable // 2:
                tk //= 2
            tk = max(128, tk)
            if tk >= D:
                tk = D
    nk = _cdiv(D, tk)
    if nk == 1:
        tk = D

    # --- row tiling ---
    if min_row_tiles is None:
        # Splitting rows is free in the resident-weight regime (constant w1
        # block index -> fetched once); it lets both v7x TensorCores work.
        min_row_tiles = 2 if nk == 1 else 1
    want = tile_m if tile_m is not None else (512 if nk == 1 else 1024)
    tm = min(_round_up(want, 8), n8)
    if min_row_tiles > 1 and n8 >= 8 * min_row_tiles:
        tm = min(tm, _round_up(_cdiv(n8, min_row_tiles), 8))
    while tm > 8 and footprint(tm, tk, nk) > usable:
        tm = _round_up(tm // 2, 8)
    return tm, tk, nk


# ---------------------------------------------------------------------------
# Wrapper
# ---------------------------------------------------------------------------
def out_stage1(x, w1, b1, w2, b2, *, tile_m=None, max_tile_k=None,
               mxu_dtype=jnp.bfloat16, min_row_tiles=None,
               vmem_budget_bytes=None, interpret=False):
    """x: [..., D] -> [..., 1], fused linear-GELU-linear.

    w1: [D, H], b1: [H], w2: [H, 1], b2: [1]  (weights stored [in, out], i.e.
    transposed vs. PyTorch, so matmuls are plain x @ W).

    x is streamed at its own dtype; pass bf16 activations to halve HBM traffic
    (accumulation stays f32).  Full-f32 MXU path via mxu_dtype=jnp.float32.
    """
    orig_shape = x.shape
    D, H = w1.shape
    assert orig_shape[-1] == D
    xf = x.reshape(-1, D)  # no dtype cast here: cast happens in-kernel
    N = xf.shape[0]

    if vmem_budget_bytes is None:
        vmem_budget_bytes = _vmem_budget_bytes()
    w_isz = jnp.dtype(mxu_dtype).itemsize
    x_isz = jnp.dtype(xf.dtype).itemsize
    tm, tk, nk = _choose_config(N, D, H, x_isz, w_isz, tile_m, max_tile_k,
                                vmem_budget_bytes, min_row_tiles)

    w1c = w1.astype(mxu_dtype)                      # small one-time weight cast
    b1_2d = b1.reshape(1, H).astype(jnp.float32)
    w2_2d = w2.reshape(1, H).astype(jnp.float32)    # row layout for VPU reduce
    b2_s = b2.reshape(1).astype(jnp.float32)        # scalar -> SMEM

    n_row_tiles = _cdiv(N, tm)
    out_dtype = x.dtype
    compiler_params = pltpu.CompilerParams(
        dimension_semantics=("parallel",) if nk == 1
        else ("parallel", "arbitrary"),
        vmem_limit_bytes=int(vmem_budget_bytes),
    )

    if nk == 1:
        # Resident-weight path: w1 block index is constant, so Pallas fetches
        # the whole weight from HBM exactly once; no accumulator scratch.
        # TODO(synk): pipeline_mode=pl.Buffered(1) on the w1/b1/w2 specs would
        # drop their redundant second buffer (worth ~D*H*itemsize on v7x).
        out = pl.pallas_call(
            _out_stage1_kernel_resident,
            out_shape=jax.ShapeDtypeStruct((N, 1), out_dtype),
            grid_spec=pltpu.PrefetchScalarGridSpec(
                num_scalar_prefetch=0,
                grid=(n_row_tiles,),
                in_specs=[
                    pl.BlockSpec((tm, D), lambda i: (i, 0)),      # x rows
                    pl.BlockSpec((D, H), lambda i: (0, 0)),       # w1 (resident)
                    pl.BlockSpec((1, H), lambda i: (0, 0)),       # b1 row
                    pl.BlockSpec((1, H), lambda i: (0, 0)),       # w2 row
                    pl.BlockSpec(memory_space=pltpu.MemorySpace.SMEM),  # b2
                ],
                out_specs=pl.BlockSpec((tm, 1), lambda i: (i, 0)),
            ),
            compiler_params=compiler_params,
            interpret=interpret,
        )(xf, w1c, b1_2d, w2_2d, b2_s)
    else:
        d_pad = nk * tk
        mask_last_k = d_pad != D
        if mask_last_k:
            # Pad only the weight (one-time, tiny next to x); x's stale lanes
            # in the last K block are zero-masked inside the kernel.
            w1c = jnp.pad(w1c, ((0, d_pad - D), (0, 0)))
        kernel = functools.partial(_out_stage1_kernel_streamed,
                                   tk=tk, d_total=D, mask_last_k=mask_last_k)
        out = pl.pallas_call(
            kernel,
            out_shape=jax.ShapeDtypeStruct((N, 1), out_dtype),
            grid_spec=pltpu.PrefetchScalarGridSpec(
                num_scalar_prefetch=0,
                grid=(n_row_tiles, nk),
                in_specs=[
                    pl.BlockSpec((tm, tk), lambda i, k: (i, k)),  # x tile
                    pl.BlockSpec((tk, H), lambda i, k: (k, 0)),   # w1 tile
                    pl.BlockSpec((1, H), lambda i, k: (0, 0)),    # b1 row
                    pl.BlockSpec((1, H), lambda i, k: (0, 0)),    # w2 row
                    pl.BlockSpec(memory_space=pltpu.MemorySpace.SMEM),  # b2
                ],
                # Constant block index across K -> resident output, written on
                # the last K step only.
                out_specs=pl.BlockSpec((tm, 1), lambda i, k: (i, 0)),
                scratch_shapes=[pltpu.VMEM((tm, H), jnp.float32)],
            ),
            compiler_params=compiler_params,
            interpret=interpret,
        )(xf, w1c, b1_2d, w2_2d, b2_s)

    return out.reshape(orig_shape[:-1] + (1,))


def init_params(key, dim):
    """Deterministic synthetic init mirroring nn.Linear shapes.

    linear1: dim -> dim//2     out: dim//2 -> 1
    Weights stored transposed vs. PyTorch ([in, out]) for direct x @ W.
    """
    h = dim // 2
    k1, k2, k3, k4 = jax.random.split(key, 4)
    lim1 = 1.0 / math.sqrt(dim)
    lim2 = 1.0 / math.sqrt(h)
    w1 = jax.random.uniform(k1, (dim, h), jnp.float32, -lim1, lim1)
    b1 = jax.random.uniform(k2, (h,), jnp.float32, -lim1, lim1)
    w2 = jax.random.uniform(k3, (h, 1), jnp.float32, -lim2, lim2)
    b2 = jax.random.uniform(k4, (1,), jnp.float32, -lim2, lim2)
    return w1, b1, w2, b2


if __name__ == "__main__":
    # Small shapes: batch=2, seq=8, dim=32 (hidden = dim//2 = 16).
    batch, seq, dim = 2, 8, 32
    key = jax.random.PRNGKey(0)
    kx, kp = jax.random.split(key)
    x = jax.random.normal(kx, (batch, seq, dim), jnp.float32)
    w1, b1, w2, b2 = init_params(kp, dim)

    # Pure-JAX reference (matches the PyTorch module).
    ref = _gelu_exact(x @ w1 + b1) @ w2 + b2

    # Default path: bf16 MXU operands, f32 accumulate/GELU -> loosened tolerance.
    y = jax.block_until_ready(out_stage1(x, w1, b1, w2, b2))
    assert y.shape == (batch, seq, 1)
    assert jnp.allclose(y, ref, atol=5e-2, rtol=5e-2)

    # Full-f32 MXU path matches the reference tightly.
    y32 = jax.block_until_ready(
        out_stage1(x, w1, b1, w2, b2, mxu_dtype=jnp.float32))
    assert jnp.allclose(y32, ref, atol=1e-5, rtol=1e-5)

    # bf16 activations streamed directly (halved x HBM traffic), bf16 output.
    y_bf = jax.block_until_ready(
        out_stage1(x.astype(jnp.bfloat16), w1, b1, w2, b2))
    assert y_bf.shape == (batch, seq, 1)
    assert jnp.allclose(y_bf.astype(jnp.float32), ref, atol=1e-1, rtol=1e-1)

    # Row count not a multiple of 8 / of the tile -> partial-block path (no pads).
    x_r = jax.random.normal(kx, (3, 5, dim), jnp.float32)
    ref_r = _gelu_exact(x_r @ w1 + b1) @ w2 + b2
    y_r = jax.block_until_ready(
        out_stage1(x_r, w1, b1, w2, b2, mxu_dtype=jnp.float32))
    assert y_r.shape == (3, 5, 1)
    assert jnp.allclose(y_r, ref_r, atol=1e-5, rtol=1e-5)

    # K-tiled (weight-streaming) path with a D remainder -> exercises the
    # resident-accumulator scratch and the in-kernel last-block lane mask.
    dim2 = 160
    x2 = jax.random.normal(kx, (2, 8, dim2), jnp.float32)
    w1b, b1b, w2b, b2b = init_params(jax.random.PRNGKey(1), dim2)
    ref2 = _gelu_exact(x2 @ w1b + b1b) @ w2b + b2b
    y2 = jax.block_until_ready(
        out_stage1(x2, w1b, b1b, w2b, b2b, max_tile_k=128,
                   mxu_dtype=jnp.float32))
    assert y2.shape == (2, 8, 1)
    assert jnp.allclose(y2, ref2, atol=5e-4, rtol=5e-4)

    print("KERNEL_OK")
</pallas_src>

<mosaic_0001>
module attributes {stable_mosaic.version = 11 : i64} {
  func.func @_out_stage1_kernel_resident(%arg0: i32, %arg1: memref<8x32xf32, #tpu.memory_space<vmem>>, %arg2: memref<32x16xbf16, #tpu.memory_space<vmem>>, %arg3: memref<1x16xf32, #tpu.memory_space<vmem>>, %arg4: memref<1x16xf32, #tpu.memory_space<vmem>>, %arg5: memref<1xf32, #tpu.memory_space<smem>>, %arg6: memref<8x1xf32, #tpu.memory_space<vmem>>) attributes {dimension_semantics = [#tpu.dimension_semantics<parallel>], iteration_bounds = array<i64: 2>, scalar_prefetch = 0 : i64, scratch_operands = 0 : i64, tpu.core_type = #tpu.core_type<tc>, window_params = [{transform_indices = @transform_0, window_bounds = array<i64: 8, 32>}, {pipeline_mode = #tpu.pipeline_mode<synchronous>, transform_indices = @transform_1, window_bounds = array<i64: 32, 16>}, {pipeline_mode = #tpu.pipeline_mode<synchronous>, transform_indices = @transform_2, window_bounds = array<i64: 1, 16>}, {pipeline_mode = #tpu.pipeline_mode<synchronous>, transform_indices = @transform_3, window_bounds = array<i64: 1, 16>}, {transform_indices = @transform_4, window_bounds = array<i64: 1>}, {transform_indices = @transform_5, window_bounds = array<i64: 8, 1>}]} {
    %c0 = arith.constant 0 : index
    %c0_0 = arith.constant 0 : index
    %0 = vector.load %arg1[%c0, %c0_0] : memref<8x32xf32, #tpu.memory_space<vmem>>, vector<8x32xf32>
    %1 = arith.truncf %0 : vector<8x32xf32> to vector<8x32xbf16>
    %c0_1 = arith.constant 0 : index
    %c0_2 = arith.constant 0 : index
    %2 = vector.load %arg2[%c0_1, %c0_2] : memref<32x16xbf16, #tpu.memory_space<vmem>>, vector<32x16xbf16>
    %cst = arith.constant dense<0.000000e+00> : vector<8x16xf32>
    %3 = tpu.matmul %1, %2, %cst {dimension_numbers = #tpu.dot_dimension_numbers<[1], [0], [0], [1], [0, 0, 1, 1], [], []>} : vector<8x32xbf16>, vector<32x16xbf16>, vector<8x16xf32> -> vector<8x16xf32>
    %c0_3 = arith.constant 0 : index
    %c0_4 = arith.constant 0 : index
    %4 = vector.load %arg3[%c0_3, %c0_4] : memref<1x16xf32, #tpu.memory_space<vmem>>, vector<1x16xf32>
    %5 = vector.broadcast %4 : vector<1x16xf32> to vector<8x16xf32>
    %6 = arith.addf %3, %5 : vector<8x16xf32>
    %cst_5 = arith.constant 5.000000e-01 : f32
    %7 = vector.broadcast %cst_5 : f32 to vector<8x16xf32>
    %8 = arith.mulf %7, %6 : vector<8x16xf32>
    %cst_6 = arith.constant 1.41421354 : f32
    %9 = vector.broadcast %cst_6 : f32 to vector<8x16xf32>
    %10 = arith.divf %6, %9 : vector<8x16xf32>
    %11 = math.erf %10 : vector<8x16xf32>
    %cst_7 = arith.constant 1.000000e+00 : f32
    %12 = vector.broadcast %cst_7 : f32 to vector<8x16xf32>
    %13 = arith.addf %12, %11 : vector<8x16xf32>
    %14 = arith.mulf %8, %13 : vector<8x16xf32>
    %c0_8 = arith.constant 0 : index
    %c0_9 = arith.constant 0 : index
    %15 = vector.load %arg4[%c0_8, %c0_9] : memref<1x16xf32, #tpu.memory_space<vmem>>, vector<1x16xf32>
    %16 = vector.broadcast %15 : vector<1x16xf32> to vector<8x16xf32>
    %17 = arith.mulf %14, %16 : vector<8x16xf32>
    %cst_10 = arith.constant dense<0.000000e+00> : vector<8xf32>
    %18 = vector.multi_reduction <add>, %17, %cst_10 [1] : vector<8x16xf32> to vector<8xf32>
    %19 = vector.shape_cast %18 : vector<8xf32> to vector<8x1xf32>
    %c0_11 = arith.constant 0 : index
    %20 = memref.load %arg5[%c0_11] : memref<1xf32, #tpu.memory_space<smem>>
    %21 = vector.broadcast %20 : f32 to vector<8x1xf32>
    %22 = arith.addf %19, %21 : vector<8x1xf32>
    %c0_12 = arith.constant 0 : index
    %c0_13 = arith.constant 0 : index
    %23 = vector.load %arg6[%c0_12, %c0_13] : memref<8x1xf32, #tpu.memory_space<vmem>>, vector<8x1xf32>
    tpu.vector_store %arg6[%c0_12, %c0_13], %22 {strides = array<i32>} : memref<8x1xf32, #tpu.memory_space<vmem>>, vector<8x1xf32>,
    return
  }
  func.func @transform_0(%arg0: i32) -> (i32, i32) {
    %c0_i32 = arith.constant 0 : i32
    %c0_i32_0 = arith.constant 0 : i32
    return %arg0, %c0_i32 : i32, i32
  }
  func.func @transform_1(%arg0: i32) -> (i32, i32) {
    %c0_i32 = arith.constant 0 : i32
    %c0_i32_0 = arith.constant 0 : i32
    %c0_i32_1 = arith.constant 0 : i32
    return %c0_i32, %c0_i32_0 : i32, i32
  }
  func.func @transform_2(%arg0: i32) -> (i32, i32) {
    %c0_i32 = arith.constant 0 : i32
    %c0_i32_0 = arith.constant 0 : i32
    %c0_i32_1 = arith.constant 0 : i32
    return %c0_i32, %c0_i32_0 : i32, i32
  }
  func.func @transform_3(%arg0: i32) -> (i32, i32) {
    %c0_i32 = arith.constant 0 : i32
    %c0_i32_0 = arith.constant 0 : i32
    %c0_i32_1 = arith.constant 0 : i32
    return %c0_i32, %c0_i32_0 : i32, i32
  }
  func.func @transform_4(%arg0: i32) -> i32 {
    %c0_i32 = arith.constant 0 : i32
    %c0_i32_0 = arith.constant 0 : i32
    return %c0_i32 : i32
  }
  func.func @transform_5(%arg0: i32) -> (i32, i32) {
    %c0_i32 = arith.constant 0 : i32
    %c0_i32_0 = arith.constant 0 : i32
    return %arg0, %c0_i32 : i32, i32
  }
}

</mosaic_0001>

<bundles_post_ra>
// kernel: tpu_custom_call.1
= control target key start
LH: loop header
LB: loop body
LE: loop exit
PB: predicated region body
PF: predicated region fallthrough
CT: control target
= control target key end

     0   :  { %s449_s20 = smov 0   ;;  %s478_s0 = inlined_call_operand.vmem [shape: f32[16,32], index: 0, kind: input, shape index: {}]   ;;  %s479_s1 = inlined_call_operand.vmem [shape: bf16[32,16], index: 1, kind: input, shape index: {}]   ;;  %s480_s2 = inlined_call_operand.vmem [shape: f32[1,16], index: 2, kind: input, shape index: {}]   ;;  %s481_s3 = inlined_call_operand.vmem [shape: f32[1,16], index: 3, kind: input, shape index: {}]   ;;  %s482_s4 = inlined_call_operand.<no memory space> [shape: f32[1], index: 4, kind: input, shape index: {}]   ;;  %s483_s5 = inlined_call_operand.vmem [shape: f32[16,1], index: 5, kind: output, shape index: {}]  }
   0x1   :  { %10 = sst [smem:[#allocation2]] %s482_s4 }
   0x2 LB: > { %s367_s21 = sadd.s32 4294967295, %s412_s20   ;;  %p371_p0 = scmp.ge.s32.totalorder %s412_s20, 1  ;;  %s412_s20 = sphi %s449_s20, %s16_s20  }
   0x3   : > { %p187_p1 = scmp.lt.s32.totalorder %s412_s20, 3 }
   0x5   : > { %p188_p2 = pnand %p371_p0, %p187_p1 }
   0x6   : > { %v402_v0 = vld [vmem:[%s479_s1] sm:$0xff] (!%p188_p2)   ;;  %v414_v1 = vmov (!%p188_p2), 0.0   ;;  %v403_v2 = vld [vmem:[%s479_s1 + $0x8] sm:$0xff] (!%p188_p2)   ;;  %vm415_vm0 = vmmov (!%p188_p2), 0   ;;  %p213_p3 = scmp.lt.s32.totalorder (!%p188_p2), %s367_s21, 1  ;;  %vm247_vm1 = vcmask (!%p188_p2), 261120  }
   0x7   : > { %191 = sbr.rel (%p188_p2) target bundleno = 399 (0x18f), region = 40  ;;  %384 = vmatprep.subr.bf16.mxu0 (!%p188_p2), %v414_v1  ;;  %388 = vmatprep.mubr.msk.bf16.mxu0 (!%p188_p2), %vm415_vm0, %v414_v1  ;;  %v374_v5 = vld [vmem:[%s480_s2] ss:$0 sm:$0xff] (!%p188_p2)  ;;  %vm305_vm2 = vcmask (!%p188_p2), 130048   ;;  %s309_s8 = sld [smem:[#allocation2]] (!%p188_p2)  ;;  %vm312_vm3 = vcmask (!%p188_p2), 7168  }
   0x8   : > { %385 = vmatpush3.bf16.msra.mxu0 (!%p188_p2), %v402_v0  ;;  %v378_v15 = vld [vmem:[%s481_s3] ss:$0 sm:$0xff] (!%p188_p2) }
   0x9   : > { %386 = vmatprep.subr.bf16.mxu0 (!%p188_p2), %v414_v1 }
   0xc   : > { %387 = vmatpush3.bf16.msra.mxu0 (!%p188_p2), %v403_v2 }
   0xd   : > { %v310_v19 = vstv (!%p188_p2), %s309_s8 }
   0xe   : > { %s485_s21 = smov (!%p213_p3, %s367_s21), 1 }
   0xf   : > { %s372_s25 = sshll.u32 %s485_s21, 3 }
  0x10   : > { %s216_s28 = scalar_lea.vmem %s478_s0, %s372_s25  ;;  %s220_s11 = scalar_lea.vmem %s483_s5, %s372_s25 }
  0x11   : > { %v222_v3 = vld [vmem:[%s216_s28] sm:$0xff] }
  0x12   : > { %v223_v4 = vpack.c.bf16 %v222_v3, %v222_v3 }
  0x14   : > { %389 = vmatmul.mubr.msk.bf16.vlgmr.msra.gmra.mrb[0].mxu0 %vm247_vm1, %v223_v4 }
  0xe7   : > { %v285_v6 = vpop.f32.mrb[0].mxu0 }
  0xe8   : > { %v286_v7 = vadd.f32 %v374_v5, %v285_v6  ;;  %v390_v8 = vpop.f32.mrb[1].mxu0 }
  0xe9   : > { %v288_v9 = vpop.f32.mrb[2].mxu0 }
  0xea   : > { %v293_v10 = vmul.f32 0.70710677, %v286_v7  ;;  %v391_v11 = vpop.f32.mrb[3].mxu0  ;;  %v291_v13 = vmul.f32 0.5, %v286_v7 }
  0xec   : > { %404 = verf.f32 %v293_v10 }
  0xf6   : > { %v405_v12 = vpop.eup %404 }
  0xf7   : > { %v295_v14 = vadd.f32 1.0, %v405_v12 }
  0xf9   : > { %v296_v16 = vmul.f32 %v295_v14, %v291_v13 }
  0xfb   : > { %v304_v17 = vmul.f32 %v378_v15, %v296_v16 }
  0xfd   : > { %v306_v18 = vsel %vm305_vm2, %v304_v17, 0.0 }
  0xfe   : > { %307 = vadd.xlane.f32.xlu0 %v306_v18 }
 0x18b   : > { %v308_v20 = vpop.xlane.xlu0 %307 }
 0x18c   : > { %v311_v21 = vadd.f32 %v310_v19, %v308_v20 }
 0x18e   : > { %313 = vst.msk [vmem:[%s220_s11] sm:$0xff] %vm312_vm3, %v311_v21 }
 0x18f PF: > { %s16_s20 = sadd.s32 1, %s412_s20  }
 0x190   : > { %p13_p4 = scmp.ge.s32.totalorder %s16_s20, 4  }
 0x192   :  { %15 = sbr.rel (!%p13_p4) target bundleno = 2 (0x2), region = 70 }

</bundles_post_ra>
